<compile_context>
chip_gen: v6e
topology: v6e:2x2x1
jax: 0.10.0
libtpu: 0.0.40
codegen_flags: <defaults>
</compile_context>

<pallas_src>
import functools

import jax
import jax.numpy as jnp
from jax.experimental import pallas as pl
from jax.experimental.pallas import tpu as pltpu


def _patch_kernel_flat(col0, d, base_ref, comp_ref, out_ref):
    # base_ref: (1, L*D)   class-invariant slab (positional embedding folded in)
    # comp_ref: (TN, D)    per-class row = comp_embedding[c] + pos[n_head+1]
    # out_ref : (TN, L*D)  lane-dense output tile
    # Sublane broadcast of the invariant slab; cheap relative to the output
    # HBM store DMA, which is the binding resource for this kernel.
    out_ref[...] = jnp.broadcast_to(base_ref[...], out_ref.shape)
    # Static column window.  When D % 128 != 0 this is a masked store, but it
    # touches only D/(L*D) of the block -- do NOT expand comp to (TN, L*D),
    # that would double HBM read traffic for no benefit.
    out_ref[:, col0:col0 + d] = comp_ref[...]


def _patch_kernel_3d(patch_tile, patch_row, base_ref, comp_ref, out_ref):
    # Huge-row fallback tiling (L*D row too big for the flat path):
    # base_ref: (1, TL, D); comp_ref: (TN, 1, D); out_ref: (TN, TL, D)
    out_ref[...] = jnp.broadcast_to(base_ref[...], out_ref.shape)

    @pl.when(pl.program_id(1) == patch_tile)
    def _():
        out_ref[:, patch_row, :] = comp_ref[:, 0, :]


def _vmem_capacity_bytes():
    # Generation-aware VMEM capacity: 64 MiB/TC on v7x, 128 MiB on v5e/v6e.
    # Fall back to the conservative (v7x) value if the query is unavailable.
    try:
        info = pltpu.get_tpu_info()
        cap = getattr(info, "vmem_capacity_bytes", None)
        if cap:
            return int(cap)
    except Exception:
        pass
    return 64 * 1024 * 1024


def component_prompt_learner_forward(token_ids, embed_table, prompt_vectors_head,
                                     comp_embedding, positional_embedding, n_head,
                                     *, force_pallas=False):
    """token_ids: (L,) int32; embed_table: (V, D); prompt_vectors_head: (n_head, D);
    comp_embedding: (N, 1, D); positional_embedding: (1, L, D).  Returns (N, L, D)."""
    L = token_ids.shape[0]
    V, D = embed_table.shape
    N = comp_embedding.shape[0]
    assert prompt_vectors_head.shape[0] == n_head
    assert n_head + 2 <= L, "prompt head + component row must fit in ctx_length"

    # Output dtype follows the module's parameter dtypes (bf16 stays bf16 ->
    # half the HBM writeback vs. an unconditional f32 upcast).
    out_dtype = jnp.result_type(embed_table.dtype, prompt_vectors_head.dtype,
                                comp_embedding.dtype, positional_embedding.dtype)

    pos = positional_embedding[0].astype(out_dtype)                    # (L, D)

    # ---- class-invariant prep (once, plain XLA) -------------------------
    # Gather FIRST, cast second: never materialize a cast (V, D) table copy.
    tok = embed_table[token_ids].astype(out_dtype)                     # (L, D)
    base = tok.at[1:1 + n_head, :].set(prompt_vectors_head.astype(out_dtype))
    base = base + pos                                                  # pos embed folded in

    # The only per-class data: one row per class (pos embed folded in).
    comp_patch = comp_embedding[:, 0, :].astype(out_dtype) + pos[n_head + 1, :]  # (N, D)

    itemsize = jnp.dtype(out_dtype).itemsize
    LD = L * D
    out_bytes = N * LD * itemsize

    # Tiny problems: kernel launch + per-step pipeline overhead dominates;
    # let XLA fuse a trivial broadcast + row set.
    if not force_pallas and out_bytes < 2 * 1024 * 1024:
        out = jnp.broadcast_to(base[None], (N, L, D))
        return out.at[:, n_head + 1, :].set(comp_patch)

    vmem_cap = _vmem_capacity_bytes()
    budget = vmem_cap // 5                       # per-output-buffer budget (double-buffered)
    vmem_limit = min(100 * 1024 * 1024, (vmem_cap * 3) // 4)
    sub = max(8, 32 // itemsize)                 # sublane tile: 8 (f32) / 16 (bf16/fp16)

    cost = pl.CostEstimate(flops=0, transcendentals=0,
                           bytes_accessed=(N * LD + N * D + LD) * itemsize)

    row_bytes = LD * itemsize
    rows_fit = max(1, budget // row_bytes)

    if rows_fit >= sub or rows_fit >= N:
        # ---- flat, lane-dense (N, L*D) path -----------------------------
        tn = min(N, rows_fit)
        # v7x megacore: prefer >= 2 grid steps (sublane-aligned) so both
        # TensorCores drive HBM stores when all classes would fit in 1 block.
        if tn >= N and N >= 2 * sub:
            half = -(-N // 2)
            tn = ((half + sub - 1) // sub) * sub
        if tn < N:
            # rows_fit >= sub in this branch, so this never inflates past the budget.
            tn = max(sub, (tn // sub) * sub)
        grid_n = pl.cdiv(N, tn)
        # NOTE: when tn does not divide N, the trailing block reads padded comp
        # rows and Pallas masks the out-of-range output writeback (blocked specs).
        kernel = functools.partial(_patch_kernel_flat, (n_head + 1) * D, D)
        out_flat = pl.pallas_call(
            kernel,
            out_shape=jax.ShapeDtypeStruct((N, LD), out_dtype),
            grid_spec=pltpu.PrefetchScalarGridSpec(
                num_scalar_prefetch=0,
                grid=(grid_n,),
                in_specs=[
                    pl.BlockSpec((1, LD), lambda i: (0, 0)),   # invariant slab
                    pl.BlockSpec((tn, D), lambda i: (i, 0)),   # per-class rows
                ],
                out_specs=pl.BlockSpec((tn, LD), lambda i: (i, 0)),
            ),
            compiler_params=pltpu.CompilerParams(
                dimension_semantics=("parallel",),             # classes independent
                vmem_limit_bytes=vmem_limit),
            cost_estimate=cost,
        )(base.reshape(1, LD), comp_patch)
        return out_flat.reshape(N, L, D)

    # ---- huge-row path: tile the sequence axis too -----------------------
    # Taken only when fewer than `sub` flat rows fit in the budget (very large
    # L*D); keeps every block within the generation-aware VMEM budget.
    tn = min(N, sub)
    tl_fit = max(1, budget // (tn * D * itemsize))
    tl = L if tl_fit >= L else min(L, max(8, (tl_fit // 8) * 8))
    patch_tile, patch_row = divmod(n_head + 1, tl)
    kernel = functools.partial(_patch_kernel_3d, patch_tile, patch_row)
    out = pl.pallas_call(
        kernel,
        out_shape=jax.ShapeDtypeStruct((N, L, D), out_dtype),
        grid_spec=pltpu.PrefetchScalarGridSpec(
            num_scalar_prefetch=0,
            grid=(pl.cdiv(N, tn), pl.cdiv(L, tl)),
            in_specs=[
                pl.BlockSpec((1, tl, D), lambda i, j: (0, j, 0)),
                pl.BlockSpec((tn, 1, D), lambda i, j: (i, 0, 0)),
            ],
            out_specs=pl.BlockSpec((tn, tl, D), lambda i, j: (i, j, 0)),
        ),
        compiler_params=pltpu.CompilerParams(
            dimension_semantics=("parallel", "parallel"),
            vmem_limit_bytes=vmem_limit),
        cost_estimate=cost,
    )(base[None], comp_patch[:, None, :])
    return out


def _reference_forward(token_ids, embed_table, prompt_vectors_head,
                       comp_embedding, positional_embedding, n_head):
    N = comp_embedding.shape[0]
    tok = embed_table[token_ids]                       # (L, D)
    tok = jnp.broadcast_to(tok, (N,) + tok.shape)      # (N, L, D)
    tok = tok.at[:, 1:n_head + 1, :].set(prompt_vectors_head[None])
    tok = tok.at[:, n_head + 1:n_head + 2, :].set(comp_embedding)
    return tok + positional_embedding


if __name__ == "__main__":
    key = jax.random.PRNGKey(0)
    ks = jax.random.split(key, 8)

    # ---- test 1: small f32 shapes, force the Pallas path ----------------
    V, D, L, n_head, N = 64, 32, 8, 2, 6
    token_ids = jnp.array([1, 10, 11, 12, 2, 0, 0, 0], dtype=jnp.int32)
    embed_table = jax.random.normal(ks[0], (V, D), jnp.float32) * 0.02
    prompt_vectors_head = jax.random.normal(ks[1], (n_head, D), jnp.float32) * 0.02
    comp_embedding = jax.random.normal(ks[2], (N, 1, D), jnp.float32) * 0.02
    positional_embedding = jax.random.normal(ks[3], (1, L, D), jnp.float32) * 0.01

    out = component_prompt_learner_forward(
        token_ids, embed_table, prompt_vectors_head, comp_embedding,
        positional_embedding, n_head, force_pallas=True)
    out = jax.block_until_ready(out)
    ref = _reference_forward(token_ids, embed_table, prompt_vectors_head,
                             comp_embedding, positional_embedding, n_head)
    assert out.shape == (N, L, D) and out.dtype == jnp.float32
    assert jnp.allclose(out, ref, atol=1e-6, rtol=1e-6)

    # small-problem auto path (XLA fallback) must match too
    out_auto = jax.block_until_ready(component_prompt_learner_forward(
        token_ids, embed_table, prompt_vectors_head, comp_embedding,
        positional_embedding, n_head))
    assert jnp.allclose(out_auto, ref, atol=1e-6, rtol=1e-6)

    # ---- test 2: bf16 params, multi-block class grid (tests padding path) --
    V2, D2, L2, nh2, N2 = 64, 128, 8, 2, 40
    tid2 = jnp.array([1, 9, 10, 11, 2, 0, 0, 0], dtype=jnp.int32)
    et2 = (jax.random.normal(ks[4], (V2, D2), jnp.float32) * 0.02).astype(jnp.bfloat16)
    ph2 = (jax.random.normal(ks[5], (nh2, D2), jnp.float32) * 0.02).astype(jnp.bfloat16)
    ce2 = (jax.random.normal(ks[6], (N2, 1, D2), jnp.float32) * 0.02).astype(jnp.bfloat16)
    pe2 = (jax.random.normal(ks[7], (1, L2, D2), jnp.float32) * 0.01).astype(jnp.bfloat16)

    out2 = jax.block_until_ready(component_prompt_learner_forward(
        tid2, et2, ph2, ce2, pe2, nh2, force_pallas=True))
    ref2 = _reference_forward(tid2, et2, ph2, ce2, pe2, nh2)
    assert out2.shape == (N2, L2, D2) and out2.dtype == jnp.bfloat16
    assert jnp.allclose(out2.astype(jnp.float32), ref2.astype(jnp.float32),
                        atol=2e-2, rtol=2e-2)

    print("KERNEL_OK")
</pallas_src>

<mosaic_0001>
module attributes {stable_mosaic.version = 11 : i64} {
  func.func @_patch_kernel_flat(%arg0: i32, %arg1: memref<1x256xf32, #tpu.memory_space<vmem>>, %arg2: memref<6x32xf32, #tpu.memory_space<vmem>>, %arg3: memref<6x256xf32, #tpu.memory_space<vmem>>) attributes {dimension_semantics = [#tpu.dimension_semantics<parallel>], iteration_bounds = array<i64: 1>, scalar_prefetch = 0 : i64, scratch_operands = 0 : i64, tpu.core_type = #tpu.core_type<tc>, window_params = [{pipeline_mode = #tpu.pipeline_mode<synchronous>, transform_indices = @transform_0, window_bounds = array<i64: 1, 256>}, {transform_indices = @transform_1, window_bounds = array<i64: 6, 32>}, {transform_indices = @transform_2, window_bounds = array<i64: 6, 256>}]} {
    %c0 = arith.constant 0 : index
    %c0_0 = arith.constant 0 : index
    %0 = vector.load %arg1[%c0, %c0_0] : memref<1x256xf32, #tpu.memory_space<vmem>>, vector<1x256xf32>
    %1 = vector.shape_cast %0 : vector<1x256xf32> to vector<1x256xf32>
    %2 = vector.broadcast %1 : vector<1x256xf32> to vector<6x256xf32>
    %c0_1 = arith.constant 0 : index
    %c0_2 = arith.constant 0 : index
    %3 = vector.load %arg3[%c0_1, %c0_2] : memref<6x256xf32, #tpu.memory_space<vmem>>, vector<6x256xf32>
    tpu.vector_store %arg3[%c0_1, %c0_2], %2 {strides = array<i32>} : memref<6x256xf32, #tpu.memory_space<vmem>>, vector<6x256xf32>,
    %c0_3 = arith.constant 0 : index
    %c0_4 = arith.constant 0 : index
    %4 = vector.load %arg2[%c0_3, %c0_4] : memref<6x32xf32, #tpu.memory_space<vmem>>, vector<6x32xf32>
    %c0_5 = arith.constant 0 : index
    %c96 = arith.constant 96 : index
    %5 = vector.load %arg3[%c0_5, %c96] : memref<6x256xf32, #tpu.memory_space<vmem>>, vector<6x32xf32>
    tpu.vector_store %arg3[%c0_5, %c96], %4 {strides = array<i32>} : memref<6x256xf32, #tpu.memory_space<vmem>>, vector<6x32xf32>,
    return
  }
  func.func @transform_0(%arg0: i32) -> (i32, i32) {
    %c0_i32 = arith.constant 0 : i32
    %c0_i32_0 = arith.constant 0 : i32
    %c0_i32_1 = arith.constant 0 : i32
    return %c0_i32, %c0_i32_0 : i32, i32
  }
  func.func @transform_1(%arg0: i32) -> (i32, i32) {
    %c0_i32 = arith.constant 0 : i32
    %c0_i32_0 = arith.constant 0 : i32
    return %arg0, %c0_i32 : i32, i32
  }
  func.func @transform_2(%arg0: i32) -> (i32, i32) {
    %c0_i32 = arith.constant 0 : i32
    %c0_i32_0 = arith.constant 0 : i32
    return %arg0, %c0_i32 : i32, i32
  }
}

</mosaic_0001>

<bundles_post_ra>
// kernel: tpu_custom_call.1
= control target key start
LH: loop header
LB: loop body
LE: loop exit
PB: predicated region body
PF: predicated region fallthrough
CT: control target
= control target key end

     0   :  { %7 = vsyncpa [#allocation3], 0  ;;  %s171_s0 = inlined_call_operand.hbm [shape: f32[1,256], index: 0, kind: input, shape index: {}]   ;;  %s172_s1 = inlined_call_operand.hbm [shape: f32[6,32], index: 1, kind: input, shape index: {}]   ;;  %s173_s2 = inlined_call_operand.hbm [shape: f32[6,256], index: 2, kind: output, shape index: {}]  }
   0x1   :  { %8 = vsyncpa [#allocation6], 0 }
   0x2   :  { %9 = vsyncpa [#allocation4], 0  ;;  %s143_s9 = smov [#allocation2]   ;;  %s144_s11 = smov [#allocation5]  }
   0x3   :  { %s16_s10 = sshll.u32 %s143_s9, 4  ;;  %s26_s12 = sshll.u32 %s144_s11, 4  ;;  %s17_s10 = int_to_ptr.vmem [resolvable:$true] %s16_s10  ;;  %s27_s12 = int_to_ptr.vmem [resolvable:$true] %s26_s12 }
   0x4   :  { %s85_s13 = scalar_lea.vmem %s17_s10, 32  ;;  %p90_p1 = scmp.lt.s32.totalorder %s17_s10, %s17_s10 }
   0x5   :  { %p86_p0 = scmp.ne.s32.totalorder %s17_s10, %s85_s13  ;;  %p91_p2 = scmp.lt.s32.totalorder %s85_s13, %s85_s13 }
   0x7   :  { %p92_p3 = por %p91_p2, %p90_p1 }
   0x9   :  { %p93_p4 = pnand %p92_p3, %p86_p0 }
   0xb   :  { %96 = shalt.err (!%p93_p4)
}
   0xc   :  { %19 = dma.hbm_to_vmem [thread:$0]  %s171_s0, 32, %s17_s10, [#allocation3]  }
   0xd   :  { %s105_s16 = scalar_lea.vmem %s27_s12, 128  ;;  %p110_p6 = scmp.lt.s32.totalorder %s27_s12, %s27_s12 }
   0xe   :  { %p106_p5 = scmp.ne.s32.totalorder %s27_s12, %s105_s16  ;;  %p111_p7 = scmp.lt.s32.totalorder %s105_s16, %s105_s16 }
  0x10   :  { %p112_p8 = por %p111_p7, %p110_p6 }
  0x12   :  { %p113_p9 = pnand %p112_p8, %p106_p5 }
  0x14   :  { %116 = shalt.err (!%p113_p9)
}
  0x15   :  { %29 = dma.hbm_to_vmem [thread:$0]  %s172_s1, 128, %s27_s12, [#allocation6]  }
  0x16   :  { %137 = dma.done.wait [#allocation3], 32  }
  0x17   :  { %138 = vsyncadd [#allocation3], 4294967264 }
  0x18   :  { %139 = dma.done.wait [#allocation6], 128  }
  0x19   :  { %140 = vsyncadd [#allocation6], 4294967168  ;;  %v38_v0 = vlaneseq  ;;  %v50_v4 = vld [vmem:[#allocation5] sm:$0x3f]  ;;  %v36_v5 = vld [vmem:[#allocation2] sm:$0x3] }
  0x1a   :  { %s145_s0 = smov 96   ;;  %s146_s19 = smov [#allocation7]   ;;  %vm55_vm0 = vcmask 1046272  }
  0x1b   :  { %v39_v1 = vshrl.u32 %v38_v0, 7  ;;  %52 = vrot.lane.b32.xlu0 %v50_v4, %s145_s0  ;;  %s63_s20 = sshll.u32 %s146_s19, 4  ;;  %s64_s20 = int_to_ptr.vmem [resolvable:$true] %s63_s20 }
  0x1c   :  { %s117_s1 = scalar_lea.vmem %s64_s20, 256  ;;  %p122_p11 = scmp.lt.s32.totalorder %s64_s20, %s64_s20 }
  0x1d   :  { %v40_v2 = vsub.s32 0, %v39_v1  ;;  %v44_v3 = vsub.s32 1, %v39_v1  ;;  %p118_p10 = scmp.ne.s32.totalorder %s64_s20, %s117_s1  ;;  %p123_p12 = scmp.lt.s32.totalorder %s117_s1, %s117_s1 }
  0x1f   :  { %v41_v6 = vrot.slane %v36_v5, %v40_v2  ;;  %v45_v7 = vrot.slane %v36_v5, %v44_v3  ;;  %p124_p13 = por %p123_p12, %p122_p11 }
  0x21   :  { %48 = vst [vmem:[#allocation7] sm:$0x3f] %v41_v6  ;;  %49 = vst [vmem:[#allocation7 + $0x8] sm:$0x3f] %v45_v7  ;;  %p125_p0 = pnand %p124_p13, %p118_p10 }
  0x8d   :  { %v53_v8 = vpop.permute.xlu0 %52 }
  0x8e   :  { %56 = vst.msk [vmem:[#allocation7] sm:$0x3f] %vm55_vm0, %v53_v8 }
  0x8f   :  { %128 = shalt.err (!%p125_p0)
}
  0x90   :  { %66 = dma.vmem_to_hbm [thread:$0]  %s64_s20, 256, %s173_s2, [#allocation4]  }
  0x91   :  { %141 = dma.done.wait [#allocation4], 256  }
  0x92   :  { %142 = vsyncadd [#allocation4], 4294967040 }
  0x93   :  { %70 = vsyncpa [#allocation3], 1 }
  0x94   :  { %71 = vsyncpa [#allocation6], 1 }
  0x95   :  { %72 = vsyncpa [#allocation4], 1 }

</bundles_post_ra>
